<compile_context>
chip_gen: v5e
topology: v5e:2x2
jax: 0.10.0
libtpu: 0.0.40
codegen_flags: <defaults>
</compile_context>

<pallas_src>
import jax
import jax.numpy as jnp
from jax.experimental import pallas as pl
from jax.experimental.pallas import tpu as pltpu

EPSILON = 1e-7
TILE_D_MAX = 2048          # multiple of 128; keeps per-block bytes ~0.5–2 MiB


# --------------------------------------------------------------------------- #
# Kernel
# --------------------------------------------------------------------------- #
def _attack_kernel(pre_ref, x_ref, w_ref, b_ref, logits_ref, xround_ref):
    k = pl.program_id(1)
    last_k = pl.num_programs(1) - 1

    # ---- elementwise attack transform: f32 math on narrow (bf16/u8) I/O ----
    pre = pre_ref[...].astype(jnp.float32)
    x = x_ref[...]
    if jnp.issubdtype(x.dtype, jnp.integer):
        x = x.astype(jnp.int32)            # zero-extend u8 before the f32 convert
    x = x.astype(jnp.float32)

    noise = 10.0 * jnp.tanh(pre)           # EUP
    x_clip = jnp.clip(x + noise, 0.0, 255.0)
    x_round = jnp.floor(x_clip)            # == torch `x_clip // 1` (x_clip >= 0)
    # Integer-valued in [0, 255] -> uint8 store is lossless (4x less write BW).
    xround_ref[...] = x_round.astype(jnp.int32).astype(xround_ref.dtype)

    # ---- inner linear model (normalization pre-folded into w_eff/b_eff) ----
    @pl.when(k == 0)
    def _init():
        logits_ref[...] = jnp.zeros_like(logits_ref)

    logits_ref[...] += jnp.dot(x_round, w_ref[...],
                               preferred_element_type=jnp.float32)

    @pl.when(k == last_k)
    def _finalize():
        logits_ref[...] += b_ref[...]      # (1, K) broadcasts over (tile_b, K)


# --------------------------------------------------------------------------- #
# Tiling helpers
# --------------------------------------------------------------------------- #
def _round_up(n, m):
    return ((n + m - 1) // m) * m


def _tile_d_for(D):
    """Deterministic D tile / padded-D choice shared by weight prep and fwd."""
    d128 = _round_up(D, 128)
    tile_d = min(d128, TILE_D_MAX)
    return tile_d, _round_up(D, tile_d)


def _vmem_budget():
    """(block budget, vmem_limit_bytes) derived from the actual chip."""
    try:
        cap = int(pltpu.get_tpu_info().vmem_capacity_bytes)
    except Exception:  # pragma: no cover - conservative (v7x-sized) fallback
        cap = 64 * 1024 * 1024
    return cap // 2, (cap * 3) // 4


def _pick_tile_b(tile_d, k_pad, pre_bytes, x_bytes, xr_bytes, budget):
    """Largest multiple-of-32 batch tile whose double-buffered set fits."""
    # The Pallas pipeline double-buffers *every* operand, including the
    # grid-invariant weights/bias (a constant index_map does not disable it).
    resident = 2 * tile_d * k_pad * 4 + 2 * k_pad * 4
    per_row = 2 * tile_d * (pre_bytes + x_bytes + xr_bytes) + 2 * k_pad * 4
    avail = max(budget - resident, 32 * per_row)
    tile = (avail // per_row) // 32 * 32
    return int(max(32, min(tile, 256)))


def _maybe_pad2d(a, rows, cols):
    r, c = a.shape
    if (r, c) == (rows, cols):
        return a                            # fast path: no extra HBM copy
    return jnp.pad(a, ((0, rows - r), (0, cols - c)))


# --------------------------------------------------------------------------- #
# One-time model preparation (hoisted out of the per-call path)
# --------------------------------------------------------------------------- #
def prepare_classifier(w, b, mean_c, std_c, hw, epsilon=EPSILON):
    """Fold (mean, std) normalization into the linear classifier and pad it
    for the kernel.  Call once per (w, b, mean, std); reuse across attack steps.

      w: [D, K], b: [K], mean_c/std_c: per-channel [C], hw = H*W (NCHW layout).
    Returns (w_eff_padded [D_pad, K_pad] f32, b_eff_padded [1, K_pad] f32).
    """
    w = w.astype(jnp.float32)
    b = b.astype(jnp.float32)
    D, K = w.shape
    mean_flat = jnp.repeat(mean_c.astype(jnp.float32), hw)               # [D]
    inv_std = 1.0 / (jnp.repeat(std_c.astype(jnp.float32), hw) + epsilon)
    w_eff = w * inv_std[:, None]                                         # [D, K]
    b_eff = b - (mean_flat * inv_std) @ w                                # [K]

    _, D_pad = _tile_d_for(D)
    K_pad = max(128, _round_up(K, 128))
    if (D_pad, K_pad) != (D, K):
        w_eff = jnp.pad(w_eff, ((0, D_pad - D), (0, K_pad - K)))
    b_p = jnp.pad(b_eff, (0, K_pad - K)).reshape(1, K_pad)
    return w_eff, b_p


# --------------------------------------------------------------------------- #
# Forward pass
# --------------------------------------------------------------------------- #
def attack_forward(pre_noise, x, w_p, b_p, num_classes):
    """pre_noise: [B,C,H,W] (bf16 preferred), x: [B,C,H,W] (uint8 preferred).
       w_p, b_p: outputs of prepare_classifier().
       Returns (logits [B, num_classes] f32, x_round [B,C,H,W] uint8)."""
    B = x.shape[0]
    D = 1
    for s in x.shape[1:]:
        D *= s
    D_pad_w, K_pad = w_p.shape
    tile_d, D_pad = _tile_d_for(D)
    assert D_pad == D_pad_w, "weights were prepared for a different input size"

    pre_flat = pre_noise.reshape(B, D)       # reshape only: no dtype copies here
    x_flat = x.reshape(B, D)

    pre_bytes = pre_flat.dtype.itemsize
    x_bytes = x_flat.dtype.itemsize
    xr_dtype = jnp.uint8                     # floor(clip(.,0,255)) is exact in u8
    xr_bytes = 1

    budget, vmem_limit = _vmem_budget()
    tile_b = _pick_tile_b(tile_d, K_pad, pre_bytes, x_bytes, xr_bytes, budget)
    b_pad32 = _round_up(B, 32)
    if b_pad32 >= 64:
        # keep >=2 batch tiles so v7x's two TensorCores both get work
        tile_b = min(tile_b, max(32, (b_pad32 // 2) // 32 * 32))
    tile_b = min(tile_b, b_pad32)            # don't over-pad tiny batches
    B_pad = _round_up(B, tile_b)

    pre_p = _maybe_pad2d(pre_flat, B_pad, D_pad)
    x_p = _maybe_pad2d(x_flat, B_pad, D_pad)

    grid = (B_pad // tile_b, D_pad // tile_d)     # reduction (D) axis last
    n_b_tiles = grid[0]
    cost = pl.CostEstimate(
        flops=2 * B_pad * D_pad * K_pad,
        transcendentals=B_pad * D_pad,
        bytes_accessed=(B_pad * D_pad * (pre_bytes + x_bytes + xr_bytes)
                        + n_b_tiles * D_pad * K_pad * 4
                        + B_pad * K_pad * 4),
    )

    logits_p, xround_p = pl.pallas_call(
        _attack_kernel,
        out_shape=(
            jax.ShapeDtypeStruct((B_pad, K_pad), jnp.float32),
            jax.ShapeDtypeStruct((B_pad, D_pad), xr_dtype),
        ),
        grid=grid,
        in_specs=[
            pl.BlockSpec((tile_b, tile_d), lambda i, k: (i, k)),   # pre_noise
            pl.BlockSpec((tile_b, tile_d), lambda i, k: (i, k)),   # x
            pl.BlockSpec((tile_d, K_pad), lambda i, k: (k, 0)),    # folded weights
            pl.BlockSpec((1, K_pad), lambda i, k: (0, 0)),         # folded bias
        ],
        out_specs=(
            pl.BlockSpec((tile_b, K_pad), lambda i, k: (i, 0)),    # logits (acc over k)
            pl.BlockSpec((tile_b, tile_d), lambda i, k: (i, k)),   # x_round
        ),
        compiler_params=pltpu.CompilerParams(
            dimension_semantics=("parallel", "arbitrary"),
            vmem_limit_bytes=int(vmem_limit),
        ),
        cost_estimate=cost,
    )(pre_p, x_p, w_p, b_p)

    logits = logits_p[:B, :num_classes]
    x_round = xround_p[:B, :D].reshape(x.shape)
    return logits, x_round


# --------------------------------------------------------------------------- #
# Pure-JAX reference (for the correctness check)
# --------------------------------------------------------------------------- #
def _reference(pre_noise, x, mean_c, std_c, w, b, epsilon=EPSILON):
    B, C, H, W = x.shape
    x = x.astype(jnp.float32)
    pre = pre_noise.astype(jnp.float32)
    noise = 10.0 * jnp.tanh(pre)
    x_clip = jnp.clip(x + noise, 0.0, 255.0)
    x_round = jnp.floor(x_clip)
    mean = mean_c.reshape(1, C, 1, 1)
    std = std_c.reshape(1, C, 1, 1)
    x_norm = (x_round - mean) / (std + epsilon)
    logits = x_norm.reshape(B, -1) @ w + b
    return logits, x_round


if __name__ == "__main__":
    key = jax.random.PRNGKey(0)
    k1, k2, k3, k4 = jax.random.split(key, 4)

    B, C, H, W = 2, 4, 16, 16
    D = C * H * W
    K = 10  # number of classes of the synthetic inner model

    # Narrow HBM I/O: uint8 image, bf16 noise parameters (kernel math is f32).
    x = jax.random.randint(k1, (B, C, H, W), 0, 256, dtype=jnp.int32).astype(jnp.uint8)
    pre_noise = (jax.random.normal(k2, (B, C, H, W), jnp.float32) * 0.5).astype(jnp.bfloat16)
    mean_c = jnp.array([120.0, 115.0, 110.0, 125.0], dtype=jnp.float32)
    std_c = jnp.array([60.0, 58.0, 62.0, 59.0], dtype=jnp.float32)
    w = jax.random.normal(k3, (D, K), jnp.float32) * 0.02
    b = jax.random.normal(k4, (K,), jnp.float32) * 0.01

    # One-time weight folding/padding (reused across attack iterations).
    w_p, b_p = prepare_classifier(w, b, mean_c, std_c, H * W)

    logits, x_round = attack_forward(pre_noise, x, w_p, b_p, num_classes=K)
    jax.block_until_ready((logits, x_round))

    ref_logits, ref_x_round = _reference(pre_noise, x, mean_c, std_c, w, b)
    assert logits.shape == (B, K) and x_round.shape == (B, C, H, W)
    assert jnp.allclose(logits, ref_logits, atol=1e-3, rtol=1e-3)
    assert jnp.allclose(x_round.astype(jnp.float32), ref_x_round, atol=1e-5)

    print("KERNEL_OK")
</pallas_src>

<mosaic_0001>
module attributes {stable_mosaic.version = 11 : i64} {
  func.func @_attack_kernel(%arg0: i32, %arg1: i32, %arg2: memref<32x1024xbf16, #tpu.memory_space<vmem>>, %arg3: memref<32x1024xi8, #tpu.memory_space<vmem>>, %arg4: memref<1024x128xf32, #tpu.memory_space<vmem>>, %arg5: memref<1x128xf32, #tpu.memory_space<vmem>>, %arg6: memref<32x128xf32, #tpu.memory_space<vmem>>, %arg7: memref<32x1024xi8, #tpu.memory_space<vmem>>) attributes {dimension_semantics = [#tpu.dimension_semantics<parallel>, #tpu.dimension_semantics<arbitrary>], iteration_bounds = array<i64: 1, 1>, scalar_prefetch = 0 : i64, scratch_operands = 0 : i64, tpu.core_type = #tpu.core_type<tc>, window_params = [{transform_indices = @transform_0, window_bounds = array<i64: 32, 1024>}, {transform_indices = @transform_1, window_bounds = array<i64: 32, 1024>}, {transform_indices = @transform_2, window_bounds = array<i64: 1024, 128>}, {pipeline_mode = #tpu.pipeline_mode<synchronous>, transform_indices = @transform_3, window_bounds = array<i64: 1, 128>}, {transform_indices = @transform_4, window_bounds = array<i64: 32, 128>}, {transform_indices = @transform_5, window_bounds = array<i64: 32, 1024>}]} {
    %c0 = arith.constant 0 : index
    %c0_0 = arith.constant 0 : index
    %0 = vector.load %arg2[%c0, %c0_0] : memref<32x1024xbf16, #tpu.memory_space<vmem>>, vector<32x1024xbf16>
    %1 = arith.extf %0 : vector<32x1024xbf16> to vector<32x1024xf32>
    %c0_1 = arith.constant 0 : index
    %c0_2 = arith.constant 0 : index
    %2 = vector.load %arg3[%c0_1, %c0_2] : memref<32x1024xi8, #tpu.memory_space<vmem>>, vector<32x1024xi8>
    %3 = arith.extui %2 : vector<32x1024xi8> to vector<32x1024xi32>
    %4 = arith.sitofp %3 : vector<32x1024xi32> to vector<32x1024xf32>
    %5 = math.tanh %1 : vector<32x1024xf32>
    %cst = arith.constant 1.000000e+01 : f32
    %6 = vector.broadcast %cst : f32 to vector<32x1024xf32>
    %7 = arith.mulf %6, %5 : vector<32x1024xf32>
    %8 = arith.addf %4, %7 : vector<32x1024xf32>
    %cst_3 = arith.constant 0.000000e+00 : f32
    %cst_4 = arith.constant 2.550000e+02 : f32
    %9 = vector.broadcast %cst_3 : f32 to vector<32x1024xf32>
    %10 = arith.maximumf %9, %8 : vector<32x1024xf32>
    %11 = vector.broadcast %cst_4 : f32 to vector<32x1024xf32>
    %12 = arith.minimumf %11, %10 : vector<32x1024xf32>
    %13 = math.floor %12 : vector<32x1024xf32>
    %14 = arith.fptosi %13 : vector<32x1024xf32> to vector<32x1024xi32>
    %15 = arith.trunci %14 : vector<32x1024xi32> to vector<32x1024xi8>
    %c0_5 = arith.constant 0 : index
    %c0_6 = arith.constant 0 : index
    %16 = vector.load %arg7[%c0_5, %c0_6] : memref<32x1024xi8, #tpu.memory_space<vmem>>, vector<32x1024xi8>
    tpu.vector_store %arg7[%c0_5, %c0_6], %15 {strides = array<i32>} : memref<32x1024xi8, #tpu.memory_space<vmem>>, vector<32x1024xi8>,
    %c0_i32 = arith.constant 0 : i32
    %17 = arith.cmpi eq, %arg1, %c0_i32 : i32
    %18 = arith.extui %17 : i1 to i32
    %c0_i32_7 = arith.constant 0 : i32
    %19 = arith.cmpi ne, %18, %c0_i32_7 : i32
    scf.if %19 {
      %cst_17 = arith.constant 0.000000e+00 : f32
      %28 = vector.broadcast %cst_17 : f32 to vector<32x128xf32>
      %c0_18 = arith.constant 0 : index
      %c0_19 = arith.constant 0 : index
      %29 = vector.load %arg6[%c0_18, %c0_19] : memref<32x128xf32, #tpu.memory_space<vmem>>, vector<32x128xf32>
      tpu.vector_store %arg6[%c0_18, %c0_19], %28 {strides = array<i32>} : memref<32x128xf32, #tpu.memory_space<vmem>>, vector<32x128xf32>,
    } else {
    }
    %c0_8 = arith.constant 0 : index
    %c0_9 = arith.constant 0 : index
    %20 = vector.load %arg6[%c0_8, %c0_9] : memref<32x128xf32, #tpu.memory_space<vmem>>, vector<32x128xf32>
    %c0_10 = arith.constant 0 : index
    %c0_11 = arith.constant 0 : index
    %21 = vector.load %arg4[%c0_10, %c0_11] : memref<1024x128xf32, #tpu.memory_space<vmem>>, vector<1024x128xf32>
    %cst_12 = arith.constant dense<0.000000e+00> : vector<32x128xf32>
    %22 = tpu.matmul %13, %21, %cst_12 {dimension_numbers = #tpu.dot_dimension_numbers<[1], [0], [0], [1], [0, 0, 1, 1], [], []>} : vector<32x1024xf32>, vector<1024x128xf32>, vector<32x128xf32> -> vector<32x128xf32>
    %23 = arith.addf %20, %22 : vector<32x128xf32>
    %c0_13 = arith.constant 0 : index
    %c0_14 = arith.constant 0 : index
    %24 = vector.load %arg6[%c0_13, %c0_14] : memref<32x128xf32, #tpu.memory_space<vmem>>, vector<32x128xf32>
    tpu.vector_store %arg6[%c0_13, %c0_14], %23 {strides = array<i32>} : memref<32x128xf32, #tpu.memory_space<vmem>>, vector<32x128xf32>,
    %c0_i32_15 = arith.constant 0 : i32
    %25 = arith.cmpi eq, %arg1, %c0_i32_15 : i32
    %26 = arith.extui %25 : i1 to i32
    %c0_i32_16 = arith.constant 0 : i32
    %27 = arith.cmpi ne, %26, %c0_i32_16 : i32
    scf.if %27 {
      %c0_17 = arith.constant 0 : index
      %c0_18 = arith.constant 0 : index
      %28 = vector.load %arg6[%c0_17, %c0_18] : memref<32x128xf32, #tpu.memory_space<vmem>>, vector<32x128xf32>
      %c0_19 = arith.constant 0 : index
      %c0_20 = arith.constant 0 : index
      %29 = vector.load %arg5[%c0_19, %c0_20] : memref<1x128xf32, #tpu.memory_space<vmem>>, vector<1x128xf32>
      %30 = vector.broadcast %29 : vector<1x128xf32> to vector<32x128xf32>
      %31 = arith.addf %28, %30 : vector<32x128xf32>
      %c0_21 = arith.constant 0 : index
      %c0_22 = arith.constant 0 : index
      %32 = vector.load %arg6[%c0_21, %c0_22] : memref<32x128xf32, #tpu.memory_space<vmem>>, vector<32x128xf32>
      tpu.vector_store %arg6[%c0_21, %c0_22], %31 {strides = array<i32>} : memref<32x128xf32, #tpu.memory_space<vmem>>, vector<32x128xf32>,
    } else {
    }
    return
  }
  func.func @transform_0(%arg0: i32, %arg1: i32) -> (i32, i32) {
    %c0_i32 = arith.constant 0 : i32
    return %arg0, %arg1 : i32, i32
  }
  func.func @transform_1(%arg0: i32, %arg1: i32) -> (i32, i32) {
    %c0_i32 = arith.constant 0 : i32
    return %arg0, %arg1 : i32, i32
  }
  func.func @transform_2(%arg0: i32, %arg1: i32) -> (i32, i32) {
    %c0_i32 = arith.constant 0 : i32
    %c0_i32_0 = arith.constant 0 : i32
    return %arg1, %c0_i32 : i32, i32
  }
  func.func @transform_3(%arg0: i32, %arg1: i32) -> (i32, i32) {
    %c0_i32 = arith.constant 0 : i32
    %c0_i32_0 = arith.constant 0 : i32
    %c0_i32_1 = arith.constant 0 : i32
    return %c0_i32, %c0_i32_0 : i32, i32
  }
  func.func @transform_4(%arg0: i32, %arg1: i32) -> (i32, i32) {
    %c0_i32 = arith.constant 0 : i32
    %c0_i32_0 = arith.constant 0 : i32
    return %arg0, %c0_i32 : i32, i32
  }
  func.func @transform_5(%arg0: i32, %arg1: i32) -> (i32, i32) {
    %c0_i32 = arith.constant 0 : i32
    return %arg0, %arg1 : i32, i32
  }
}

</mosaic_0001>

<bundles_post_ra>
// kernel: tpu_custom_call.1
= control target key start
LH: loop header
LB: loop body
LE: loop exit
PB: predicated region body
PF: predicated region fallthrough
CT: control target
= control target key end

     0   :  { %11 = vsyncpa [#allocation3], 0  ;;  %s1497_s0 = inlined_call_operand.hbm [shape: bf16[32,1024], index: 0, kind: input, shape index: {}]   ;;  %s1498_s1 = inlined_call_operand.hbm [shape: u8[32,1024], index: 1, kind: input, shape index: {}]   ;;  %s1499_s2 = inlined_call_operand.hbm [shape: f32[1024,128], index: 2, kind: input, shape index: {}]   ;;  %s1500_s3 = inlined_call_operand.vmem [shape: f32[1,128], index: 3, kind: input, shape index: {}]   ;;  %s1501_s4 = inlined_call_operand.hbm [shape: f32[32,128], index: 4, kind: output, shape index: {0}]   ;;  %s1502_s5 = inlined_call_operand.hbm [shape: u8[32,1024], index: 5, kind: output, shape index: {1}]  }
   0x1   :  { %12 = vsyncpa [#allocation6], 0 }
   0x2   :  { %13 = vsyncpa [#allocation4], 0  ;;  %s33_s20 = sshll.u32 %s1498_s1, 4  ;;  %s34_s20 = int_to_ptr.hbm [resolvable:$true] %s33_s20 }
   0x3   :  { %14 = vsyncpa [#allocation10], 0  ;;  %s1176_s21 = smov [#allocation5]   ;;  %s19_s25 = sshll.u32 %s1497_s0, 4  ;;  %s20_s25 = int_to_ptr.hbm [resolvable:$true] %s19_s25 }
   0x4   :  { %s35_s22 = sshll.u32 %s1176_s21, 4  ;;  %s1177_s26 = smov [#allocation2]   ;;  %s36_s22 = int_to_ptr.vmem [resolvable:$true] %s35_s22 }
   0x5   :  { %38 = dma.hbm_to_vmem [thread:$0]  %s34_s20, 1024, %s36_s22, [#allocation6]  }
   0x6   :  { %s21_s27 = sshll.u32 %s1177_s26, 4  ;;  %s1178_s28 = smov 512   ;;  %s22_s27 = int_to_ptr.vmem [resolvable:$true] %s21_s27 }
   0x7   :  { %s1179_s29 = smov 32   ;;  %s43_s1 = sshll.u32 %s1499_s2, 4  ;;  %s44_s1 = int_to_ptr.hbm [resolvable:$true] %s43_s1 }
   0x8   :  { %27 = dma.hbm_to_vmem [thread:$0]  %s20_s25, 2048, %s22_s27, [#allocation3], %s1178_s28, %s1178_s28, %s1179_s29  }
   0x9   :  { %s1180_s7 = smov [#allocation7]   ;;  %s1181_s9 = smov 128  }
   0xa   :  { %s45_s8 = sshll.u32 %s1180_s7, 4  ;;  %s1182_s10 = smov 8   ;;  %s46_s8 = int_to_ptr.vmem [resolvable:$true] %s45_s8 }
   0xb   :  { %51 = dma.hbm_to_vmem [thread:$0]  %s44_s1, 16384, %s46_s8, [#allocation6], %s1181_s9, %s1181_s9, %s1182_s10  }
   0xc   :  { %1168 = dma.done.wait [#allocation3], 2048  }
   0xd   :  { %1169 = vsyncadd [#allocation3], 4294965248 }
   0xe   :  { %1170 = dma.done.wait [#allocation6], 17408  }
   0xf   :  { %1171 = vsyncadd [#allocation6], 4294949888  ;;  %v501_v0 = vld [vmem:[#allocation7 + $0x78] sm:$0xff]  ;;  %v500_v2 = vld [vmem:[#allocation7 + $0x70] sm:$0xff]  ;;  %s1183_s0 = smov [#allocation9]   ;;  %s893_s13 = sshll.u32 %s1502_s5, 4  ;;  %s894_s13 = int_to_ptr.hbm [resolvable:$true] %s893_s13 }
  0x10   :  { %v533_v1 = vld [vmem:[#allocation7 + $0x178] sm:$0xff]  ;;  %614 = vmatpush.msra.mxu0 %v501_v0  ;;  %v532_v4 = vld [vmem:[#allocation7 + $0x170] sm:$0xff]  ;;  %v499_v6 = vld [vmem:[#allocation7 + $0x68] sm:$0xff]  ;;  %s891_s2 = sshll.u32 %s1183_s0, 4  ;;  %s879_s18 = sshll.u32 %s1501_s4, 4  ;;  %s892_s2 = int_to_ptr.vmem [resolvable:$true] %s891_s2  ;;  %s880_s18 = int_to_ptr.hbm [resolvable:$true] %s879_s18 }
  0x11   :  { %672 = vmatpush.msra.mxu2 %v533_v1  ;;  %v517_v3 = vld [vmem:[#allocation7 + $0xf8] sm:$0xff]  ;;  %v516_v7 = vld [vmem:[#allocation7 + $0xf0] sm:$0xff]  ;;  %v531_v8 = vld [vmem:[#allocation7 + $0x168] sm:$0xff] }
  0x12   :  { %v549_v5 = vld [vmem:[#allocation7 + $0x1f8] sm:$0xff]  ;;  %643 = vmatpush.msra.mxu1 %v517_v3  ;;  %615 = vmatpush.msra.mxu0 %v500_v2  ;;  %v548_v9 = vld [vmem:[#allocation7 + $0x1f0] sm:$0xff]  ;;  %v515_v10 = vld [vmem:[#allocation7 + $0xe8] sm:$0xff] }
  0x13   :  { %701 = vmatpush.msra.mxu3 %v549_v5  ;;  %673 = vmatpush.msra.mxu2 %v532_v4  ;;  %v498_v11 = vld [vmem:[#allocation7 + $0x60] sm:$0xff]  ;;  %v547_v13 = vld [vmem:[#allocation7 + $0x1e8] sm:$0xff]  ;;  %v497_v16 = vld [vmem:[#allocation7 + $0x58] sm:$0xff] }
  0x14   :  { %644 = vmatpush.msra.mxu1 %v516_v7  ;;  %v530_v12 = vld [vmem:[#allocation7 + $0x160] sm:$0xff]  ;;  %616 = vmatpush.msra.mxu0 %v499_v6  ;;  %v529_v17 = vld [vmem:[#allocation7 + $0x158] sm:$0xff]  ;;  %v496_v20 = vld [vmem:[#allocation7 + $0x50] sm:$0xff] }
  0x15   :  { %702 = vmatpush.msra.mxu3 %v548_v9  ;;  %674 = vmatpush.msra.mxu2 %v531_v8  ;;  %v514_v14 = vld [vmem:[#allocation7 + $0xe0] sm:$0xff]  ;;  %v513_v18 = vld [vmem:[#allocation7 + $0xd8] sm:$0xff]  ;;  %v528_v21 = vld [vmem:[#allocation7 + $0x150] sm:$0xff] }
  0x16   :  { %v546_v15 = vld [vmem:[#allocation7 + $0x1e0] sm:$0xff]  ;;  %645 = vmatpush.msra.mxu1 %v515_v10  ;;  %617 = vmatpush.msra.mxu0 %v498_v11  ;;  %v545_v19 = vld [vmem:[#allocation7 + $0x1d8] sm:$0xff]  ;;  %v512_v22 = vld [vmem:[#allocation7 + $0xd0] sm:$0xff] }
  0x17   :  { %703 = vmatpush.msra.mxu3 %v547_v13  ;;  %675 = vmatpush.msra.mxu2 %v530_v12  ;;  %v544_v23 = vld [vmem:[#allocation7 + $0x1d0] sm:$0xff]  ;;  %v495_v24 = vld [vmem:[#allocation7 + $0x48] sm:$0xff]  ;;  %v494_v28 = vld [vmem:[#allocation7 + $0x40] sm:$0xff] }
  0x18   :  { %646 = vmatpush.msra.mxu1 %v514_v14  ;;  %618 = vmatpush.msra.mxu0 %v497_v16  ;;  %v527_v25 = vld [vmem:[#allocation7 + $0x148] sm:$0xff]  ;;  %v526_v29 = vld [vmem:[#allocation7 + $0x140] sm:$0xff]  ;;  %v493_v32 = vld [vmem:[#allocation7 + $0x38] sm:$0xff] }
  0x19   :  { %704 = vmatpush.msra.mxu3 %v546_v15  ;;  %676 = vmatpush.msra.mxu2 %v529_v17  ;;  %v511_v26 = vld [vmem:[#allocation7 + $0xc8] sm:$0xff]  ;;  %v510_v30 = vld [vmem:[#allocation7 + $0xc0] sm:$0xff]  ;;  %v525_v33 = vld [vmem:[#allocation7 + $0x138] sm:$0xff] }
  0x1a   :  { %647 = vmatpush.msra.mxu1 %v513_v18  ;;  %619 = vmatpush.msra.mxu0 %v496_v20  ;;  %v543_v27 = vld [vmem:[#allocation7 + $0x1c8] sm:$0xff]  ;;  %v542_v31 = vld [vmem:[#allocation7 + $0x1c0] sm:$0xff]  ;;  %v509_v34 = vld [vmem:[#allocation7 + $0xb8] sm:$0xff] }
  0x1b   :  { %705 = vmatpush.msra.mxu3 %v545_v19  ;;  %677 = vmatpush.msra.mxu2 %v528_v21  ;;  %v541_v35 = vld [vmem:[#allocation7 + $0x1b8] sm:$0xff]  ;;  %v492_v36 = vld [vmem:[#allocation7 + $0x30] sm:$0xff]  ;;  %v491_v40 = vld [vmem:[#allocation7 + $0x28] sm:$0xff] }
  0x1c   :  { %648 = vmatpush.msra.mxu1 %v512_v22  ;;  %620 = vmatpush.msra.mxu0 %v495_v24  ;;  %v524_v37 = vld [vmem:[#allocation7 + $0x130] sm:$0xff]  ;;  %v523_v41 = vld [vmem:[#allocation7 + $0x128] sm:$0xff]  ;;  %v490_v42 = vld [vmem:[#allocation7 + $0x20] sm:$0xff] }
  0x1d   :  { %706 = vmatpush.msra.mxu3 %v544_v23  ;;  %678 = vmatpush.msra.mxu2 %v527_v25  ;;  %v508_v38 = vld [vmem:[#allocation7 + $0xb0] sm:$0xff]  ;;  %v507_v43 = vld [vmem:[#allocation7 + $0xa8] sm:$0xff]  ;;  %v522_v44 = vld [vmem:[#allocation7 + $0x120] sm:$0xff] }
  0x1e   :  { %649 = vmatpush.msra.mxu1 %v511_v26  ;;  %621 = vmatpush.msra.mxu0 %v494_v28  ;;  %v540_v39 = vld [vmem:[#allocation7 + $0x1b0] sm:$0xff]  ;;  %v539_v45 = vld [vmem:[#allocation7 + $0x1a8] sm:$0xff]  ;;  %v506_v46 = vld [vmem:[#allocation7 + $0xa0] sm:$0xff] }
  0x1f   :  { %707 = vmatpush.msra.mxu3 %v543_v27  ;;  %679 = vmatpush.msra.mxu2 %v526_v29  ;;  %v538_v47 = vld [vmem:[#allocation7 + $0x1a0] sm:$0xff]  ;;  %v67_v51 = vld [vmem:[#allocation2 + $0x8] sm:$0xff]  ;;  %v1229_v52 = vld [vmem:[#allocation5 + $0x10] sm:$0xff] }
  0x20   :  { %650 = vmatpush.msra.mxu1 %v510_v30  ;;  %622 = vmatpush.msra.mxu0 %v493_v32  ;;  %v66_v48 = vld [vmem:[#allocation2] sm:$0xff]  ;;  %v489_v54 = vld [vmem:[#allocation7 + $0x18] sm:$0xff]  ;;  %v84_v58 = vunpack.c.l.bf16 %v67_v51  ;;  %v124_v59 = vunpack.c.0.s8 %v1229_v52  ;;  %v85_v60 = vunpack.c.h.bf16 %v67_v51  ;;  %v1233_v62 = vld [vmem:[#allocation5 + $0x8] sm:$0xff]  ;;  %v132_v1 = vunpack.c.1.s8 %v1229_v52 }
  0x21   :  { %708 = vmatpush.msra.mxu3 %v542_v31  ;;  %680 = vmatpush.msra.mxu2 %v525_v33  ;;  %v82_v49 = vunpack.c.l.bf16 %v66_v48  ;;  %v1227_v50 = vld [vmem:[#allocation5] sm:$0xff]  ;;  %v83_v53 = vunpack.c.h.bf16 %v66_v48  ;;  %v521_v55 = vld [vmem:[#allocation7 + $0x118] sm:$0xff]  ;;  %v488_v3 = vld [vmem:[#allocation7 + $0x10] sm:$0xff]  ;;  %v123_v7 = vunpack.c.0.s8 %v1233_v62  ;;  %v131_v23 = vunpack.c.1.s8 %v1233_v62 }
  0x22   :  { %651 = vmatpush.msra.mxu1 %v509_v34  ;;  %623 = vmatpush.msra.mxu0 %v492_v36  ;;  %v505_v56 = vld [vmem:[#allocation7 + $0x98] sm:$0xff]  ;;  %v122_v57 = vunpack.c.0.s8 %v1227_v50  ;;  %v130_v0 = vunpack.c.1.s8 %v1227_v50  ;;  %v138_v2 = vunpack.c.2.s8 %v1227_v50  ;;  %v520_v4 = vld [vmem:[#allocation7 + $0x110] sm:$0xff]  ;;  %v1242_v6 = vand.u32 255, %v124_v59  ;;  %v487_v13 = vld [vmem:[#allocation7 + $0x8] sm:$0xff] }
  0x23   :  { %709 = vmatpush.msra.mxu3 %v541_v35  ;;  %681 = vmatpush.msra.mxu2 %v524_v37  ;;  %v537_v61 = vld [vmem:[#allocation7 + $0x198] sm:$0xff]  ;;  %984 = vtanh.f32 %v82_v49  ;;  %v504_v8 = vld [vmem:[#allocation7 + $0x90] sm:$0xff]  ;;  %v1248_v12 = vand.u32 255, %v132_v1  ;;  %v519_v14 = vld [vmem:[#allocation7 + $0x108] sm:$0xff]  ;;  %v1251_v16 = vand.u32 255, %v123_v7  ;;  %v140_v30 = vunpack.c.2.s8 %v1229_v52 }
  0x24   :  { %652 = vmatpush.msra.mxu1 %v508_v38  ;;  %624 = vmatpush.msra.mxu0 %v491_v40  ;;  %v1235_v63 = vld [vmem:[#allocation5 + $0x18] sm:$0xff]  ;;  %v1240_v5 = vand.u32 255, %v122_v57  ;;  %986 = vtanh.f32 %v84_v58  ;;  %v536_v9 = vld [vmem:[#allocation7 + $0x190] sm:$0xff]  ;;  %v1246_v11 = vand.u32 255, %v130_v0  ;;  %v486_v17 = vld [vmem:[#allocation7] sm:$0xff]  ;;  %v188_v20 = vcvt.s32.f32 %v1242_v6 }
  0x25   :  { %710 = vmatpush.msra.mxu3 %v540_v39  ;;  %682 = vmatpush.msra.mxu2 %v523_v41  ;;  %988 = vtanh.f32 %v83_v53  ;;  %v125_v10 = vunpack.c.0.s8 %v1235_v63  ;;  %v503_v18 = vld [vmem:[#allocation7 + $0x88] sm:$0xff]  ;;  %v518_v24 = vld [vmem:[#allocation7 + $0x100] sm:$0xff]  ;;  %v196_v27 = vcvt.s32.f32 %v1248_v12  ;;  %v133_v28 = vunpack.c.1.s8 %v1235_v63  ;;  %v597_v32 = vld [vmem:[#allocation7 + $0x378] sm:$0xff] }
  0x26   :  { %653 = vmatpush.msra.mxu1 %v507_v43  ;;  %625 = vmatpush.msra.mxu0 %v490_v42  ;;  %v186_v15 = vcvt.s32.f32 %v1240_v5  ;;  %990 = vtanh.f32 %v85_v60  ;;  %v535_v19 = vld [vmem:[#allocation7 + $0x188] sm:$0xff]  ;;  %v194_v22 = vcvt.s32.f32 %v1246_v11  ;;  %v70_v25 = vld [vmem:[#allocation2 + $0x20] sm:$0xff]  ;;  %v1260_v29 = vand.u32 255, %v138_v2  ;;  %v565_v41 = vld [vmem:[#allocation7 + $0x278] sm:$0xff] }
  0x27   :  { %711 = vmatpush.msra.mxu3 %v539_v45  ;;  %683 = vmatpush.msra.mxu2 %v522_v44  ;;  %v1254_v21 = vand.u32 255, %v125_v10  ;;  %v71_v26 = vld [vmem:[#allocation2 + $0x28] sm:$0xff]  ;;  %v502_v33 = vld [vmem:[#allocation7 + $0x80] sm:$0xff]  ;;  %v187_v34 = vcvt.s32.f32 %v1251_v16  ;;  %v90_v35 = vunpack.c.l.bf16 %v70_v25  ;;  %v91_v37 = vunpack.c.h.bf16 %v70_v25  ;;  %v596_v48 = vld [vmem:[#allocation7 + $0x370] sm:$0xff] }
  0x28   :  { %654 = vmatpush.msra.mxu1 %v506_v46  ;;  %626 = vmatpush.msra.mxu0 %v489_v54  ;;  %v92_v36 = vunpack.c.l.bf16 %v71_v26  ;;  %v534_v40 = vld [vmem:[#allocation7 + $0x180] sm:$0xff]  ;;  %v1264_v42 = vand.u32 255, %v131_v23  ;;  %v93_v43 = vunpack.c.h.bf16 %v71_v26  ;;  %v1266_v44 = vand.u32 255, %v133_v28  ;;  %v613_v49 = vld [vmem:[#allocation7 + $0x3f8] sm:$0xff]  ;;  %v612_v0 = vld [vmem:[#allocation7 + $0x3f0] sm:$0xff] }
  0x29   :  { %712 = vmatpush.msra.mxu3 %v538_v47  ;;  %684 = vmatpush.msra.mxu2 %v521_v55  ;;  %v985_v31 = vpop.eup %984  ;;  %v189_v47 = vcvt.s32.f32 %v1254_v21  ;;  %992 = vtanh.f32 %v90_v35  ;;  %v202_v51 = vcvt.s32.f32 %v1260_v29  ;;  %v581_v57 = vld [vmem:[#allocation7 + $0x2f8] sm:$0xff]  ;;  %v1270_v58 = vand.u32 255, %v140_v30  ;;  %v563_v1 = vld [vmem:[#allocation7 + $0x268] sm:$0xff]  ;;  %v580_v5 = vld [vmem:[#allocation7 + $0x2f0] sm:$0xff] }
  0x2a   :  { %655 = vmatpush.msra.mxu1 %v505_v56  ;;  %627 = vmatpush.msra.mxu0 %v488_v3  ;;  %v987_v38 = vpop.eup %986  ;;  %v250_v39 = vmul.f32 10.0, %v985_v31  ;;  %v564_v56 = vld [vmem:[#allocation7 + $0x270] sm:$0xff]  ;;  %994 = vtanh.f32 %v92_v36  ;;  %v195_v2 = vcvt.s32.f32 %v1264_v42  ;;  %v197_v6 = vcvt.s32.f32 %v1266_v44  ;;  %v1274_v7 = vld [vmem:[#allocation2 + $0x40] sm:$0xff]  ;;  %v593_v28 = vld [vmem:[#allocation7 + $0x358] sm:$0xff] }
  0x2b   :  { %713 = vmatpush.msra.mxu3 %v537_v61  ;;  %685 = vmatpush.msra.mxu2 %v520_v4  ;;  %v989_v45 = vpop.eup %988  ;;  %v252_v46 = vmul.f32 10.0, %v987_v38  ;;  %v595_v61 = vld [vmem:[#allocation7 + $0x368] sm:$0xff]  ;;  %996 = vtanh.f32 %v91_v37  ;;  %v204_v21 = vcvt.s32.f32 %v1270_v58  ;;  %v139_v23 = vunpack.c.2.s8 %v1233_v62  ;;  %v610_v35 = vld [vmem:[#allocation7 + $0x3e0] sm:$0xff] }
  0x2c   :  { %656 = vmatpush.msra.mxu1 %v504_v8  ;;  %628 = vmatpush.msra.mxu0 %v487_v13  ;;  %v991_v53 = vpop.eup %990  ;;  %v282_v54 = vadd.f32 %v250_v39, %v186_v15  ;;  %v251_v55 = vmul.f32 10.0, %v989_v45  ;;  %998 = vtanh.f32 %v93_v43  ;;  %v1276_v8 = vld [vmem:[#allocation2 + $0x48] sm:$0xff]  ;;  %v594_v13 = vld [vmem:[#allocation7 + $0x360] sm:$0xff]  ;;  %v98_v15 = vunpack.c.l.bf16 %v1274_v7 }
  0x2d   :  { %714 = vmatpush.msra.mxu3 %v536_v9  ;;  %686 = vmatpush.msra.mxu2 %v519_v14  ;;  %v284_v59 = vadd.f32 %v252_v46, %v188_v20  ;;  %v253_v60 = vmul.f32 10.0, %v991_v53  ;;  %v611_v14 = vld [vmem:[#allocation7 + $0x3e8] sm:$0xff]  ;;  %v100_v16 = vunpack.c.l.bf16 %v1276_v8  ;;  %v99_v30 = vunpack.c.h.bf16 %v1274_v7  ;;  %v590_v44 = vld [vmem:[#allocation7 + $0x340] sm:$0xff] }
  0x2e   :  { %657 = vmatpush.msra.mxu1 %v503_v18  ;;  %629 = vmatpush.msra.mxu0 %v486_v17  ;;  %v314_v3 = vmax.f32 %v282_v54, 0.0  ;;  %v283_v4 = vadd.f32 %v251_v55, %v187_v34  ;;  %v579_v20 = vld [vmem:[#allocation7 + $0x2e8] sm:$0xff]  ;;  %1000 = vtanh.f32 %v98_v15  ;;  %v146_v58 = vunpack.c.3.s8 %v1227_v50  ;;  %v588_v50 = vld [vmem:[#allocation7 + $0x330] sm:$0xff] }
  0x2f   :  { %715 = vmatpush.msra.mxu3 %v535_v19  ;;  %687 = vmatpush.msra.mxu2 %v518_v24  ;;  %v316_v9 = vmax.f32 %v284_v59, 0.0  ;;  %v285_v10 = vadd.f32 %v253_v60, %v189_v47  ;;  %v562_v19 = vld [vmem:[#allocation7 + $0x260] sm:$0xff]  ;;  %v993_v24 = vpop.eup %992  ;;  %1002 = vtanh.f32 %v100_v16  ;;  %v609_v59 = vld [vmem:[#allocation7 + $0x3d8] sm:$0xff]  ;;  %v559_v42 = vld [vmem:[#allocation7 + $0x248] sm:$0xff] }
  0x30   :  { %658 = vmatpush.msra.mxu1 %v502_v33  ;;  %730 = vmatpush.msrb.mxu0 %v565_v41  ;;  %v346_v17 = vmin.f32 %v314_v3, 255.0  ;;  %v315_v18 = vmax.f32 %v283_v4, 0.0  ;;  %v995_v31 = vpop.eup %994  ;;  %v258_v34 = vmul.f32 10.0, %v993_v24  ;;  %v1285_v41 = vand.u32 255, %v139_v23  ;;  %v578_v47 = vld [vmem:[#allocation7 + $0x2e0] sm:$0xff]  ;;  %v591_v4 = vld [vmem:[#allocation7 + $0x348] sm:$0xff] }
  0x31   :  { %788 = vmatpush.msrb.mxu2 %v597_v32  ;;  %716 = vmatpush.msra.mxu3 %v534_v40  ;;  %v348_v25 = vmin.f32 %v316_v9, 255.0  ;;  %v317_v26 = vmax.f32 %v285_v10, 0.0  ;;  %v997_v36 = vpop.eup %996  ;;  %v260_v39 = vmul.f32 10.0, %v995_v31  ;;  %v561_v40 = vld [vmem:[#allocation7 + $0x258] sm:$0xff]  ;;  %1004 = vtanh.f32 %v99_v30  ;;  %v558_v30 = vld [vmem:[#allocation7 + $0x240] sm:$0xff] }
  0x32   :  { %731 = vmatpush.msrb.mxu0 %v564_v56  ;;  %759 = vmatpush.msrb.mxu1 %v581_v57  ;;  %v378_v32 = vfloor.f32 %v346_v17  ;;  %v347_v33 = vmin.f32 %v315_v18, 255.0  ;;  %v999_v43 = vpop.eup %998  ;;  %v290_v46 = vadd.f32 %v258_v34, %v194_v22  ;;  %v592_v57 = vld [vmem:[#allocation7 + $0x350] sm:$0xff]  ;;  %v203_v7 = vcvt.s32.f32 %v1285_v41  ;;  %v1305_v17 = vld [vmem:[#allocation2 + $0x60] sm:$0xff]  ;;  %v575_v34 = vld [vmem:[#allocation7 + $0x2c8] sm:$0xff] }
  0x33   :  { %789 = vmatpush.msrb.mxu2 %v596_v48  ;;  %817 = vmatpush.msrb.mxu3 %v613_v49  ;;  %v380_v37 = vfloor.f32 %v348_v25  ;;  %v1283_v38 = vmin.f32 %v317_v26, 255.0  ;;  %v259_v48 = vmul.f32 10.0, %v997_v36  ;;  %v101_v49 = vunpack.c.h.bf16 %v1276_v8  ;;  %v604_v41 = vld [vmem:[#allocation7 + $0x3b0] sm:$0xff] }
  0x34   :  { %732 = vmatpush.msrb.mxu0 %v563_v1  ;;  %760 = vmatpush.msrb.mxu1 %v580_v5  ;;  %v379_v45 = vfloor.f32 %v347_v33  ;;  %v1290_v53 = vcvt.f32.s32 %v378_v32  ;;  %v292_v55 = vadd.f32 %v260_v39, %v196_v27  ;;  %v261_v56 = vmul.f32 10.0, %v999_v43  ;;  %v577_v1 = vld [vmem:[#allocation7 + $0x2d8] sm:$0xff]  ;;  %v1001_v3 = vpop.eup %1000  ;;  %v608_v5 = vld [vmem:[#allocation7 + $0x3d0] sm:$0xff] }
  0x35   :  { %790 = vmatpush.msrb.mxu2 %v595_v61  ;;  %818 = vmatpush.msrb.mxu3 %v612_v0  ;;  %v381_v54 = vfloor.f32 %v1283_v38  ;;  %v1295_v60 = vcvt.f32.s32 %v380_v37  ;;  %v322_v22 = vmax.f32 %v290_v46, 0.0  ;;  %v291_v61 = vadd.f32 %v259_v48, %v195_v2  ;;  %v560_v0 = vld [vmem:[#allocation7 + $0x250] sm:$0xff]  ;;  %v1003_v8 = vpop.eup %1002  ;;  %v589_v39 = vld [vmem:[#allocation7 + $0x338] sm:$0xff]  ;;  %v574_v46 = vld [vmem:[#allocation7 + $0x2c0] sm:$0xff] }
  0x36   :  { %733 = vmatpush.msrb.mxu0 %v562_v19  ;;  %761 = vmatpush.msrb.mxu1 %v579_v20  ;;  %v1297_v11 = vcvt.f32.s32 %v379_v45  ;;  %v324_v12 = vmax.f32 %v292_v55, 0.0  ;;  %v293_v27 = vadd.f32 %v261_v56, %v197_v6  ;;  %v576_v2 = vld [vmem:[#allocation7 + $0x2d0] sm:$0xff]  ;;  %v268_v6 = vmul.f32 10.0, %v1003_v8  ;;  %v607_v20 = vld [vmem:[#allocation7 + $0x3c8] sm:$0xff] }
  0x37   :  { %791 = vmatpush.msrb.mxu2 %v594_v13  ;;  %819 = vmatpush.msrb.mxu3 %v611_v14  ;;  %v354_v9 = vmin.f32 %v322_v22, 255.0  ;;  %v323_v10 = vmax.f32 %v291_v61, 0.0  ;;  %v266_v13 = vmul.f32 10.0, %v1001_v3  ;;  %v141_v14 = vunpack.c.2.s8 %v1235_v63  ;;  %v79_v22 = vld [vmem:[#allocation2 + $0x68] sm:$0xff] }
  0x38   :  { %630 = vmatmul.f32.vlgmr.msra.gmra.mxu0 %v378_v32  ;;  %688 = vmatmul.f32.vlgmr.msra.gmra.mxu2 %v380_v37  ;;  %v356_v15 = vmin.f32 %v324_v12, 255.0  ;;  %v325_v16 = vmax.f32 %v293_v27, 0.0  ;;  %1006 = vtanh.f32 %v101_v49  ;;  %v1309_v25 = vcvt.f32.s32 %v381_v54  ;;  %v556_v12 = vld [vmem:[#allocation7 + $0x230] sm:$0xff]  ;;  %v573_v27 = vld [vmem:[#allocation7 + $0x2b8] sm:$0xff] }
  0x39   :  { %792 = vmatpush.msrb.mxu2 %v593_v28  ;;  %820 = vmatpush.msrb.mxu3 %v610_v35  ;;  %v386_v18 = vfloor.f32 %v354_v9  ;;  %v355_v19 = vmin.f32 %v323_v10, 255.0  ;;  %v298_v23 = vadd.f32 %v266_v13, %v202_v51  ;;  %v173_v24 = vand.u32 255, %v141_v14  ;;  %v1005_v51 = vpop.eup %1004  ;;  %v587_v9 = vld [vmem:[#allocation7 + $0x328] sm:$0xff] }
  0x3a   :  { %659 = vmatmul.f32.vlgmr.msra.gmra.mxu1 %v379_v45  ;;  %734 = vmatpush.msrb.mxu0 %v561_v40  ;;  %v388_v26 = vfloor.f32 %v356_v15  ;;  %v357_v28 = vmin.f32 %v325_v16, 255.0  ;;  %v300_v31 = vadd.f32 %v268_v6, %v204_v21  ;;  %v106_v29 = vunpack.c.l.bf16 %v1305_v17  ;;  %v606_v40 = vld [vmem:[#allocation7 + $0x3c0] sm:$0xff]  ;;  %v557_v45 = vld [vmem:[#allocation7 + $0x238] sm:$0xff]  ;;  %v555_v14 = vld [vmem:[#allocation7 + $0x228] sm:$0xff] }
  0x3b   :  { %717 = vmatmul.f32.vlgmr.msra.gmra.mxu3 %v381_v54  ;;  %762 = vmatpush.msrb.mxu1 %v578_v47  ;;  %v1313_v32 = vcvt.f32.s32 %v386_v18  ;;  %v387_v33 = vfloor.f32 %v355_v19  ;;  %v330_v35 = vmax.f32 %v298_v23, 0.0  ;;  %v267_v47 = vmul.f32 10.0, %v1005_v51  ;;  %v572_v15 = vld [vmem:[#allocation7 + $0x2b0] sm:$0xff]  ;;  %v586_v23 = vld [vmem:[#allocation7 + $0x320] sm:$0xff]  ;;  %v1354_v51 = vld [vmem:[#allocation2 + $0x18] sm:$0xff] }
  0x3c   :  { %793 = vmatpush.msrb.mxu2 %v592_v57  ;;  %821 = vmatpush.msrb.mxu3 %v609_v59  ;;  %v1316_v36 = vcvt.f32.s32 %v388_v26  ;;  %v389_v37 = vfloor.f32 %v357_v28  ;;  %v332_v38 = vmax.f32 %v300_v31, 0.0  ;;  %v205_v48 = vcvt.s32.f32 %v173_v24  ;;  %v605_v57 = vld [vmem:[#allocation7 + $0x3b8] sm:$0xff]  ;;  %v603_v24 = vld [vmem:[#allocation7 + $0x3a8] sm:$0xff]  ;;  %v1346_v28 = vld [vmem:[#allocation5 + $0x20] sm:$0xff] }
  0x3d   :  { %735 = vmatpush.msrb.mxu0 %v560_v0  ;;  %763 = vmatpush.msrb.mxu1 %v577_v1  ;;  %v1319_v21 = vcvt.f32.s32 %v387_v33  ;;  %v362_v43 = vmin.f32 %v330_v35, 255.0  ;;  %v442_v54 = vpack.c.b16 %v1313_v32, %v1290_v53  ;;  %v1327_v59 = vand.u32 255, %v146_v58  ;;  %v585_v35 = vld [vmem:[#allocation7 + $0x318] sm:$0xff] }
  0x3e   :  { %794 = vmatpush.msrb.mxu2 %v591_v4  ;;  %822 = vmatpush.msrb.mxu3 %v608_v5  ;;  %v1007_v49 = vpop.eup %1006  ;;  %v1323_v55 = vcvt.f32.s32 %v389_v37  ;;  %v1325_v56 = vmin.f32 %v332_v38, 255.0  ;;  %v448_v61 = vpack.c.b16 %v1316_v36, %v1295_v60  ;;  %v299_v1 = vadd.f32 %v267_v47, %v203_v7 }
  0x3f   :  { %736 = vmatpush.msrb.mxu0 %v559_v42  ;;  %764 = vmatpush.msrb.mxu1 %v576_v2  ;;  %v394_v0 = vfloor.f32 %v362_v43  ;;  %v269_v3 = vmul.f32 10.0, %v1007_v49  ;;  %v445_v4 = vpack.c.b16 %v1319_v21, %v1297_v11  ;;  %1008 = vtanh.f32 %v106_v29  ;;  %v570_v49 = vld [vmem:[#allocation7 + $0x2a0] sm:$0xff] }
  0x40   :  { %633 = vmatmul.f32.gmra.mxu0 %v386_v18  ;;  %795 = vmatpush.msrb.mxu2 %v590_v44  ;;  %v451_v5 = vpack.c.b16 %v1323_v55, %v1309_v25  ;;  %v396_v8 = vfloor.f32 %v1325_v56  ;;  %v331_v10 = vmax.f32 %v299_v1, 0.0  ;;  %v210_v7 = vcvt.s32.f32 %v1327_v59  ;;  %v1344_v18 = vld [vmem:[#allocation2 + $0x10] sm:$0xff]  ;;  %v1382_v59 = vld [vmem:[#allocation5 + $0x38] sm:$0xff] }
  0x41   :  { %691 = vmatmul.f32.gmra.mxu2 %v388_v26  ;;  %823 = vmatpush.msrb.mxu3 %v607_v20  ;;  %v301_v42 = vadd.f32 %v269_v3, %v205_v48  ;;  %v108_v2 = vunpack.c.l.bf16 %v79_v22  ;;  %v1339_v13 = vcvt.f32.s32 %v394_v0  ;;  %v148_v16 = vunpack.c.3.s8 %v1229_v52  ;;  %v571_v52 = vld [vmem:[#allocation7 + $0x2a8] sm:$0xff]  ;;  %v602_v48 = vld [vmem:[#allocation7 + $0x3a0] sm:$0xff]  ;;  %v77_v55 = vld [vmem:[#allocation2 + $0x58] sm:$0xff] }
  0x42   :  { %662 = vmatmul.f32.gmra.mxu1 %v387_v33  ;;  %737 = vmatpush.msrb.mxu0 %v558_v30  ;;  %v107_v44 = vunpack.c.h.bf16 %v1305_v17  ;;  %v147_v6 = vunpack.c.3.s8 %v1233_v62  ;;  %v363_v19 = vmin.f32 %v331_v10, 255.0  ;;  %v109_v26 = vunpack.c.h.bf16 %v79_v22  ;;  %v554_v30 = vld [vmem:[#allocation7 + $0x220] sm:$0xff]  ;;  %v552_v22 = vld [vmem:[#allocation7 + $0x210] sm:$0xff]  ;;  %v569_v10 = vld [vmem:[#allocation7 + $0x298] sm:$0xff] }
  0x43   :  { %720 = vmatmul.f32.gmra.mxu3 %v389_v37  ;;  %765 = vmatpush.msrb.mxu1 %v575_v34  ;;  %v333_v20 = vmax.f32 %v301_v42, 0.0  ;;  %1010 = vtanh.f32 %v108_v2  ;;  %v1348_v31 = vand.u32 255, %v148_v16  ;;  %v149_v62 = vunpack.c.3.s8 %v1235_v63  ;;  %v1356_v37 = vld [vmem:[#allocation5 + $0x30] sm:$0xff]  ;;  %v553_v63 = vld [vmem:[#allocation7 + $0x218] sm:$0xff]  ;;  %v583_v16 = vld [vmem:[#allocation7 + $0x308] sm:$0xff] }
  0x44   :  { %796 = vmatpush.msrb.mxu2 %v589_v39  ;;  %824 = vmatpush.msrb.mxu3 %v606_v40  ;;  %v1350_v17 = vand.u32 255, %v147_v6  ;;  %1012 = vtanh.f32 %v107_v44  ;;  %v395_v33 = vfloor.f32 %v363_v19  ;;  %v86_v29 = vunpack.c.l.bf16 %v1344_v18  ;;  %v551_v44 = vld [vmem:[#allocation7 + $0x208] sm:$0xff] }
  0x45   :  { %738 = vmatpush.msrb.mxu0 %v557_v45  ;;  %766 = vmatpush.msrb.mxu1 %v574_v46  ;;  %v365_v34 = vmin.f32 %v333_v20, 255.0  ;;  %1014 = vtanh.f32 %v109_v26  ;;  %v1009_v38 = vpop.eup %1008  ;;  %v1358_v39 = vcvt.f32.s32 %v396_v8  ;;  %v212_v40 = vcvt.s32.f32 %v1348_v31  ;;  %v1364_v45 = vld [vmem:[#allocation5 + $0x28] sm:$0xff]  ;;  %v550_v31 = vld [vmem:[#allocation7 + $0x200] sm:$0xff] }
  0x46   :  { %797 = vmatpush.msrb.mxu2 %v588_v50  ;;  %825 = vmatpush.msrb.mxu3 %v605_v57  ;;  %v1361_v58 = vand.u32 255, %v149_v62  ;;  %v126_v43 = vunpack.c.0.s8 %v1346_v28  ;;  %v274_v47 = vmul.f32 10.0, %v1009_v38  ;;  %v211_v56 = vcvt.s32.f32 %v1350_v17  ;;  %v584_v57 = vld [vmem:[#allocation7 + $0x310] sm:$0xff]  ;;  %v567_v38 = vld [vmem:[#allocation7 + $0x288] sm:$0xff] }
  0x47   :  { %739 = vmatpush.msrb.mxu0 %v556_v12  ;;  %767 = vmatpush.msrb.mxu1 %v573_v27  ;;  %v397_v46 = vfloor.f32 %v365_v34  ;;  %1016 = vtanh.f32 %v86_v29  ;;  %v1367_v50 = vcvt.f32.s32 %v395_v33  ;;  %v88_v1 = vunpack.c.l.bf16 %v1354_v51  ;;  %v599_v29 = vld [vmem:[#allocation7 + $0x388] sm:$0xff] }
  0x48   :  { %636 = vmatmul.f32.gmra.mxu0 %v394_v0  ;;  %798 = vmatpush.msrb.mxu2 %v587_v9  ;;  %v1369_v0 = vand.u32 255, %v126_v43  ;;  %v128_v3 = vunpack.c.0.s8 %v1356_v37  ;;  %v306_v27 = vadd.f32 %v274_v47, %v210_v7  ;;  %v601_v9 = vld [vmem:[#allocation7 + $0x398] sm:$0xff]  ;;  %v87_v42 = vunpack.c.h.bf16 %v1344_v18  ;;  %v600_v18 = vld [vmem:[#allocation7 + $0x390] sm:$0xff] }
  0x49   :  { %694 = vmatmul.f32.gmra.mxu2 %v396_v8  ;;  %826 = vmatpush.msrb.mxu3 %v604_v41  ;;  %v1011_v12 = vpop.eup %1010  ;;  %v213_v8 = vcvt.s32.f32 %v1361_v58  ;;  %v127_v41 = vunpack.c.0.s8 %v1364_v45  ;;  %1018 = vtanh.f32 %v88_v1  ;;  %v89_v62 = vunpack.c.h.bf16 %v1354_v51  ;;  %v1390_v58 = vld [vmem:[#allocation2 + $0x30] sm:$0xff] }
  0x4a   :  { %740 = vmatpush.msrb.mxu0 %v555_v14  ;;  %768 = vmatpush.msrb.mxu1 %v572_v15  ;;  %v1013_v2 = vpop.eup %1012  ;;  %v1378_v14 = vcvt.f32.s32 %v397_v46  ;;  %v276_v15 = vmul.f32 10.0, %v1011_v12  ;;  %v1380_v6 = vand.u32 255, %v128_v3  ;;  %v338_v19 = vmax.f32 %v306_v27, 0.0 }
  0x4b   :  { %799 = vmatpush.msrb.mxu2 %v586_v23  ;;  %827 = vmatpush.msrb.mxu3 %v603_v24  ;;  %v1015_v7 = vpop.eup %1014  ;;  %v275_v20 = vmul.f32 10.0, %v1013_v2  ;;  %v568_v23 = vld [vmem:[#allocation7 + $0x290] sm:$0xff]  ;;  %v1384_v24 = vand.u32 255, %v127_v41  ;;  %1020 = vtanh.f32 %v87_v42  ;;  %v190_v17 = vcvt.s32.f32 %v1369_v0 }
  0x4c   :  { %665 = vmatmul.f32.gmra.mxu1 %v395_v33  ;;  %741 = vmatpush.msrb.mxu0 %v554_v30  ;;  %v308_v26 = vadd.f32 %v276_v15, %v212_v40  ;;  %v277_v30 = vmul.f32 10.0, %v1015_v7  ;;  %v370_v34 = vmin.f32 %v338_v19, 255.0  ;;  %v129_v40 = vunpack.c.0.s8 %v1382_v59 }
  0x4d   :  { %769 = vmatpush.msrb.mxu1 %v571_v52  ;;  %800 = vmatpush.msrb.mxu2 %v585_v35  ;;  %v582_v52 = vld [vmem:[#allocation7 + $0x300] sm:$0xff]  ;;  %v1017_v33 = vpop.eup %1016  ;;  %v307_v35 = vadd.f32 %v275_v20, %v211_v56  ;;  %1022 = vtanh.f32 %v89_v62  ;;  %v94_v27 = vunpack.c.l.bf16 %v1390_v58  ;;  %v134_v41 = vunpack.c.1.s8 %v1346_v28 }
  0x4e   :  { %723 = vmatmul.f32.gmra.mxu3 %v397_v46  ;;  %742 = vmatpush.msrb.mxu0 %v553_v63  ;;  %v192_v63 = vcvt.s32.f32 %v1380_v6  ;;  %v340_v43 = vmax.f32 %v308_v26, 0.0  ;;  %v309_v46 = vadd.f32 %v277_v30, %v213_v8  ;;  %v254_v47 = vmul.f32 10.0, %v1017_v33  ;;  %v566_v56 = vld [vmem:[#allocation7 + $0x280] sm:$0xff] }
  0x4f   :  { %828 = vmatpush.msrb.mxu3 %v602_v48  ;;  %770 = vmatpush.msrb.mxu1 %v570_v49  ;;  %v402_v51 = vfloor.f32 %v370_v34  ;;  %v339_v48 = vmax.f32 %v307_v35, 0.0  ;;  %v598_v49 = vld [vmem:[#allocation7 + $0x380] sm:$0xff]  ;;  %v1019_v0 = vpop.eup %1018  ;;  %1024 = vtanh.f32 %v94_v27  ;;  %v95_v21 = vunpack.c.h.bf16 %v1390_v58 }
  0x50   :  { %801 = vmatpush.msrb.mxu2 %v584_v57  ;;  %743 = vmatpush.msrb.mxu0 %v552_v22  ;;  %v191_v57 = vcvt.s32.f32 %v1384_v24  ;;  %v161_v22 = vand.u32 255, %v129_v40  ;;  %v372_v1 = vmin.f32 %v340_v43, 255.0  ;;  %v341_v3 = vmax.f32 %v309_v46, 0.0  ;;  %v73_v40 = vld [vmem:[#allocation2 + $0x38] sm:$0xff] }
  0x51   :  { %829 = vmatpush.msrb.mxu3 %v601_v9  ;;  %771 = vmatpush.msrb.mxu1 %v569_v10  ;;  %v286_v12 = vadd.f32 %v254_v47, %v190_v17  ;;  %v1021_v8 = vpop.eup %1020  ;;  %v958_v9 = vcvt.f32.s32 %v402_v51  ;;  %v371_v10 = vmin.f32 %v339_v48, 255.0  ;;  %v256_v42 = vmul.f32 10.0, %v1019_v0  ;;  %v76_v47 = vld [vmem:[#allocation2 + $0x50] sm:$0xff] }
  0x52   :  { %802 = vmatpush.msrb.mxu2 %v583_v16  ;;  %744 = vmatpush.msrb.mxu0 %v551_v44  ;;  %v404_v2 = vfloor.f32 %v372_v1  ;;  %v373_v15 = vmin.f32 %v341_v3, 255.0  ;;  %v255_v44 = vmul.f32 10.0, %v1021_v8  ;;  %v193_v20 = vcvt.s32.f32 %v161_v22 }
  0x53   :  { %830 = vmatpush.msrb.mxu3 %v600_v18  ;;  %772 = vmatpush.msrb.mxu1 %v568_v23  ;;  %v318_v16 = vmax.f32 %v286_v12, 0.0  ;;  %v443_v6 = vpack.c.b16 %v958_v9, %v1339_v13  ;;  %v403_v7 = vfloor.f32 %v371_v10  ;;  %v288_v19 = vadd.f32 %v256_v42, %v192_v63  ;;  %v1023_v18 = vpop.eup %1022 }
  0x54   :  { %803 = vmatpush.msrb.mxu2 %v582_v52  ;;  %745 = vmatpush.msrb.mxu0 %v550_v31  ;;  %v962_v23 = vcvt.f32.s32 %v404_v2  ;;  %v405_v24 = vfloor.f32 %v373_v15  ;;  %v287_v30 = vadd.f32 %v255_v44, %v191_v57  ;;  %v257_v62 = vmul.f32 10.0, %v1023_v18  ;;  %v1439_v18 = vld [vmem:[#allocation2 + $0x70] sm:$0xff] }
  0x55   :  { %831 = vmatpush.msrb.mxu3 %v599_v29  ;;  %773 = vmatpush.msrb.mxu1 %v567_v38  ;;  %v1396_v26 = vmin.f32 %v318_v16, 255.0  ;;  %v444_v52 = vpack.c.b8 %v443_v6, %v442_v54  ;;  %v960_v31 = vcvt.f32.s32 %v403_v7  ;;  %v320_v17 = vmax.f32 %v288_v19, 0.0  ;;  %v1025_v22 = vpop.eup %1024 }
  0x56   :  { %639 = vmatmul.f32.gmra.mxu0 %v402_v51  ;;  %697 = vmatmul.f32.gmra.mxu2 %v404_v2  ;;  %v449_v13 = vpack.c.b16 %v962_v23, %v1358_v39  ;;  %v964_v33 = vcvt.f32.s32 %v405_v24  ;;  %v319_v35 = vmax.f32 %v287_v30, 0.0  ;;  %v289_v63 = vadd.f32 %v257_v62, %v193_v20 }
  0x57   :  { %832 = vmatpush.msrb.mxu3 %v598_v49  ;;  %774 = vmatpush.msrb.mxu1 %v566_v56  ;;  %v382_v34 = vfloor.f32 %v1396_v26  ;;  %466 = vst [vmem:[#allocation9] sm:$0xff] %v444_v52  ;;  %v446_v29 = vpack.c.b16 %v960_v31, %v1367_v50  ;;  %v1404_v38 = vmin.f32 %v320_v17, 255.0  ;;  %v166_v39 = vand.u32 255, %v134_v41 }
  0x58   :  { %668 = vmatmul.f32.gmra.mxu1 %v403_v7  ;;  %726 = vmatmul.f32.gmra.mxu3 %v405_v24  ;;  %v450_v53 = vpack.c.b8 %v449_v13, %v448_v61  ;;  %v452_v32 = vpack.c.b16 %v964_v33, %v1378_v14  ;;  %v1410_v54 = vmin.f32 %v319_v35, 255.0  ;;  %v321_v46 = vmax.f32 %v289_v63, 0.0 }
  0x59   :  { %v447_v43 = vpack.c.b8 %v446_v29, %v445_v4  ;;  %v384_v50 = vfloor.f32 %v1404_v38  ;;  %v96_v61 = vunpack.c.l.bf16 %v73_v40  ;;  %v136_v14 = vunpack.c.1.s8 %v1356_v37 }
  0x5a   :  { %468 = vst [vmem:[#allocation9 + $0x10] sm:$0xff] %v450_v53  ;;  %v453_v60 = vpack.c.b8 %v452_v32, %v451_v5  ;;  %v383_v36 = vfloor.f32 %v1410_v54  ;;  %v1423_v11 = vmin.f32 %v321_v46, 255.0  ;;  %v135_v4 = vunpack.c.1.s8 %v1364_v45 }
  0x5b   :  { %467 = vst [vmem:[#allocation9 + $0x8] sm:$0xff] %v447_v43  ;;  %v168_v51 = vand.u32 255, %v136_v14  ;;  %1026 = vtanh.f32 %v96_v61  ;;  %v97_v25 = vunpack.c.h.bf16 %v73_v40  ;;  %v137_v58 = vunpack.c.1.s8 %v1382_v59 }
  0x5c   :  { %469 = vst [vmem:[#allocation9 + $0x18] sm:$0xff] %v453_v60  ;;  %v385_v5 = vfloor.f32 %v1423_v11  ;;  %v167_v48 = vand.u32 255, %v135_v4  ;;  %1028 = vtanh.f32 %v95_v21  ;;  %v198_v49 = vcvt.s32.f32 %v166_v39 }
  0x5d   :  { %1030 = vtanh.f32 %v97_v25  ;;  %v102_v56 = vunpack.c.l.bf16 %v76_v47  ;;  %v142_v57 = vunpack.c.2.s8 %v1346_v28  ;;  %v200_v0 = vcvt.s32.f32 %v168_v51 }
  0x5e   :  { %746 = vmatmul.f32.vlgmr.msrb.gmra.mxu0 %v382_v34  ;;  %804 = vmatmul.f32.vlgmr.msrb.gmra.mxu2 %v384_v50  ;;  %v169_v1 = vand.u32 255, %v137_v58  ;;  %v104_v3 = vunpack.c.l.bf16 %v77_v55  ;;  %v262_v12 = vmul.f32 10.0, %v1025_v22  ;;  %v144_v8 = vunpack.c.2.s8 %v1356_v37 }
  0x5f   :  { %v174_v27 = vand.u32 255, %v142_v57  ;;  %1032 = vtanh.f32 %v102_v56  ;;  %v199_v9 = vcvt.s32.f32 %v167_v48  ;;  %v103_v10 = vunpack.c.h.bf16 %v76_v47 }
  0x60   :  { %775 = vmatmul.f32.vlgmr.msrb.gmra.mxu1 %v383_v36  ;;  %833 = vmatmul.f32.vlgmr.msrb.gmra.mxu3 %v385_v5  ;;  %1034 = vtanh.f32 %v104_v3  ;;  %v143_v42 = vunpack.c.2.s8 %v1364_v45  ;;  %v294_v2 = vadd.f32 %v262_v12, %v198_v49  ;;  %v201_v15 = vcvt.s32.f32 %v169_v1 }
  0x61   :  { %v1027_v41 = vpop.eup %1026  ;;  %v176_v16 = vand.u32 255, %v144_v8  ;;  %v105_v44 = vunpack.c.h.bf16 %v77_v55  ;;  %1036 = vtanh.f32 %v103_v10  ;;  %v145_v20 = vunpack.c.2.s8 %v1382_v59 }
  0x62   :  { %v1029_v6 = vpop.eup %1028  ;;  %v264_v7 = vmul.f32 10.0, %v1027_v41  ;;  %v175_v19 = vand.u32 255, %v143_v42  ;;  %v326_v24 = vmax.f32 %v294_v2, 0.0  ;;  %v206_v52 = vcvt.s32.f32 %v174_v27  ;;  %v81_v2 = vld [vmem:[#allocation2 + $0x78] sm:$0xff] }
  0x63   :  { %v1031_v23 = vpop.eup %1030  ;;  %v263_v30 = vmul.f32 10.0, %v1029_v6  ;;  %1038 = vtanh.f32 %v105_v44  ;;  %v208_v62 = vcvt.s32.f32 %v176_v16  ;;  %v177_v13 = vand.u32 255, %v145_v20 }
  0x64   :  { %v296_v31 = vadd.f32 %v264_v7, %v200_v0  ;;  %v265_v17 = vmul.f32 10.0, %v1031_v23  ;;  %v1441_v35 = vmin.f32 %v326_v24, 255.0  ;;  %v110_v63 = vunpack.c.l.bf16 %v1439_v18 }
  0x65   :  { %v1033_v33 = vpop.eup %1032  ;;  %v295_v29 = vadd.f32 %v263_v30, %v199_v9  ;;  %v150_v40 = vunpack.c.3.s8 %v1346_v28  ;;  %v207_v46 = vcvt.s32.f32 %v175_v19  ;;  %v209_v21 = vcvt.s32.f32 %v177_v13 }
  0x66   :  { %v1035_v53 = vpop.eup %1034  ;;  %v328_v32 = vmax.f32 %v296_v31, 0.0  ;;  %v297_v39 = vadd.f32 %v265_v17, %v201_v15  ;;  %v270_v43 = vmul.f32 10.0, %v1033_v33  ;;  %v390_v60 = vfloor.f32 %v1441_v35 }
  0x67   :  { %v327_v61 = vmax.f32 %v295_v29, 0.0  ;;  %v272_v14 = vmul.f32 10.0, %v1035_v53  ;;  %v1037_v4 = vpop.eup %1036  ;;  %1040 = vtanh.f32 %v110_v63  ;;  %v182_v49 = vand.u32 255, %v150_v40 }
  0x68   :  { %v1446_v47 = vmin.f32 %v328_v32, 255.0  ;;  %v329_v51 = vmax.f32 %v297_v39, 0.0  ;;  %v302_v25 = vadd.f32 %v270_v43, %v206_v52  ;;  %749 = vmatmul.f32.gmra.mxu0 %v390_v60  ;;  %v271_v58 = vmul.f32 10.0, %v1037_v4 }
  0x69   :  { %v1039_v55 = vpop.eup %1038  ;;  %v1448_v48 = vmin.f32 %v327_v61, 255.0  ;;  %v304_v28 = vadd.f32 %v272_v14, %v208_v62  ;;  %v214_v41 = vcvt.s32.f32 %v182_v49  ;;  %v112_v23 = vunpack.c.l.bf16 %v81_v2 }
  0x6a   :  { %v392_v56 = vfloor.f32 %v1446_v47  ;;  %v1451_v57 = vmin.f32 %v329_v51, 255.0  ;;  %v334_v22 = vmax.f32 %v302_v25, 0.0  ;;  %v273_v0 = vmul.f32 10.0, %v1039_v55 }
  0x6b   :  { %v391_v1 = vfloor.f32 %v1448_v48  ;;  %v336_v3 = vmax.f32 %v304_v28, 0.0  ;;  %v303_v12 = vadd.f32 %v271_v58, %v207_v46  ;;  %v152_v52 = vunpack.c.3.s8 %v1356_v37 }
  0x6c   :  { %807 = vmatmul.f32.gmra.mxu2 %v392_v56  ;;  %v393_v27 = vfloor.f32 %v1451_v57  ;;  %v366_v8 = vmin.f32 %v334_v22, 255.0  ;;  %v305_v9 = vadd.f32 %v273_v0, %v209_v21  ;;  %1042 = vtanh.f32 %v112_v23 }
  0x6d   :  { %778 = vmatmul.f32.gmra.mxu1 %v391_v1  ;;  %v1459_v10 = vmin.f32 %v336_v3, 255.0  ;;  %v335_v42 = vmax.f32 %v303_v12, 0.0  ;;  %v1041_v15 = vpop.eup %1040  ;;  %v111_v17 = vunpack.c.h.bf16 %v1439_v18  ;;  %v151_v62 = vunpack.c.3.s8 %v1364_v45 }
  0x6e   :  { %836 = vmatmul.f32.gmra.mxu3 %v393_v27  ;;  %v398_v16 = vfloor.f32 %v366_v8  ;;  %v337_v44 = vmax.f32 %v305_v9, 0.0  ;;  %v278_v7 = vmul.f32 10.0, %v1041_v15  ;;  %v184_v33 = vand.u32 255, %v152_v52 }
  0x6f   :  { %v367_v6 = vmin.f32 %v335_v42, 255.0  ;;  %v400_v19 = vfloor.f32 %v1459_v10  ;;  %v113_v35 = vunpack.c.h.bf16 %v81_v2  ;;  %v918_v29 = vcvt.f32.s32 %v382_v34 }
  0x70   :  { %v1464_v20 = vmin.f32 %v337_v44, 255.0  ;;  %752 = vmatmul.f32.gmra.mxu0 %v398_v16  ;;  %v310_v30 = vadd.f32 %v278_v7, %v214_v41  ;;  %1044 = vtanh.f32 %v111_v17  ;;  %v153_v63 = vunpack.c.3.s8 %v1382_v59 }
  0x71   :  { %v399_v24 = vfloor.f32 %v367_v6  ;;  %v934_v40 = vcvt.f32.s32 %v390_v60  ;;  %v183_v53 = vand.u32 255, %v151_v62  ;;  %1046 = vtanh.f32 %v113_v35 }
  0x72   :  { %v401_v31 = vfloor.f32 %v1464_v20  ;;  %v342_v13 = vmax.f32 %v310_v30, 0.0  ;;  %v185_v32 = vand.u32 255, %v153_v63  ;;  %v950_v18 = vcvt.f32.s32 %v398_v16  ;;  %v1043_v43 = vpop.eup %1042 }
  0x73   :  { %v216_v45 = vcvt.s32.f32 %v184_v33  ;;  %v454_v46 = vpack.c.b16 %v934_v40, %v918_v29  ;;  %v280_v26 = vmul.f32 10.0, %v1043_v43  ;;  %v215_v34 = vcvt.s32.f32 %v183_v53 }
  0x74   :  { %810 = vmatmul.f32.gmra.mxu2 %v400_v19  ;;  %v374_v37 = vmin.f32 %v342_v13, 255.0  ;;  %v217_v21 = vcvt.s32.f32 %v185_v32  ;;  %v922_v22 = vcvt.f32.s32 %v384_v50  ;;  %v938_v0 = vcvt.f32.s32 %v392_v56 }
  0x75   :  { %781 = vmatmul.f32.gmra.mxu1 %v399_v24  ;;  %v312_v60 = vadd.f32 %v280_v26, %v216_v45  ;;  %v920_v8 = vcvt.f32.s32 %v383_v36  ;;  %v936_v10 = vcvt.f32.s32 %v391_v1  ;;  %v954_v42 = vcvt.f32.s32 %v400_v19 }
  0x76   :  { %839 = vmatmul.f32.gmra.mxu3 %v401_v31  ;;  %v406_v39 = vfloor.f32 %v374_v37  ;;  %v1045_v14 = vpop.eup %1044  ;;  %v924_v38 = vcvt.f32.s32 %v385_v5  ;;  %v940_v50 = vcvt.f32.s32 %v393_v27  ;;  %v460_v56 = vpack.c.b16 %v938_v0, %v922_v22 }
  0x77   :  { %v1047_v4 = vpop.eup %1046  ;;  %v279_v51 = vmul.f32 10.0, %v1045_v14  ;;  %v344_v28 = vmax.f32 %v312_v60, 0.0  ;;  %v952_v15 = vcvt.f32.s32 %v399_v24  ;;  %v956_v36 = vcvt.f32.s32 %v401_v31  ;;  %v983_v60 = vld [vmem:[%s1500_s3] ss:$0 sm:$0xff]  ;;  %s1184_s3 = smov [#allocation8]  }
  0x78   :  { %v966_v61 = vcvt.f32.s32 %v406_v39  ;;  %755 = vmatmul.f32.gmra.mxu0 %v406_v39  ;;  %v281_v25 = vmul.f32 10.0, %v1047_v4  ;;  %v457_v6 = vpack.c.b16 %v936_v10, %v920_v8  ;;  %v463_v7 = vpack.c.b16 %v940_v50, %v924_v38  ;;  %s877_s15 = sshll.u32 %s1184_s3, 4  ;;  %s878_s15 = int_to_ptr.vmem [resolvable:$true] %s877_s15 }
  0x79   :  { %v311_v58 = vadd.f32 %v279_v51, %v215_v34  ;;  %v376_v3 = vmin.f32 %v344_v28, 255.0 }
  0x7a   :  { %v455_v59 = vpack.c.b16 %v966_v61, %v950_v18  ;;  %v313_v49 = vadd.f32 %v281_v25, %v217_v21 }
  0x7b   :  { %v343_v12 = vmax.f32 %v311_v58, 0.0  ;;  %v408_v41 = vfloor.f32 %v376_v3 }
  0x7c   :  { %v456_v55 = vpack.c.b8 %v455_v59, %v454_v46  ;;  %v345_v9 = vmax.f32 %v313_v49, 0.0 }
  0x7d   :  { %v375_v2 = vmin.f32 %v343_v12, 255.0  ;;  %v970_v16 = vcvt.f32.s32 %v408_v41  ;;  %813 = vmatmul.f32.gmra.mxu2 %v408_v41 }
  0x7e   :  { %470 = vst [vmem:[#allocation9 + $0x20] sm:$0xff] %v456_v55  ;;  %v377_v47 = vmin.f32 %v345_v9, 255.0 }
  0x7f   :  { %v407_v54 = vfloor.f32 %v375_v2  ;;  %v461_v48 = vpack.c.b16 %v970_v16, %v954_v42 }
  0x80   :  { %v409_v44 = vfloor.f32 %v377_v47 }
  0x81   :  { %v968_v1 = vcvt.f32.s32 %v407_v54  ;;  %784 = vmatmul.f32.gmra.mxu1 %v407_v54  ;;  %v462_v11 = vpack.c.b8 %v461_v48, %v460_v56 }
  0x82   :  { %v972_v19 = vcvt.f32.s32 %v409_v44  ;;  %842 = vmatmul.f32.gmra.mxu3 %v409_v44 }
  0x83   :  { %v458_v5 = vpack.c.b16 %v968_v1, %v952_v15  ;;  %472 = vst [vmem:[#allocation9 + $0x30] sm:$0xff] %v462_v11 }
  0x84   :  { %v464_v20 = vpack.c.b16 %v972_v19, %v956_v36 }
  0x85   :  { %v459_v57 = vpack.c.b8 %v458_v5, %v457_v6 }
  0x86   :  { %v465_v27 = vpack.c.b8 %v464_v20, %v463_v7 }
  0x87   :  { %471 = vst [vmem:[#allocation9 + $0x28] sm:$0xff] %v459_v57 }
  0x88   :  { %473 = vst [vmem:[#allocation9 + $0x38] sm:$0xff] %v465_v27 }
  0x89   :  { %896 = dma.vmem_to_hbm [thread:$0]  %s892_s2, 1024, %s894_s13, [#allocation10]  }
  0xb5   :  { %v631_v23 = vpop.f32.mrf.mxu0 }
  0xb7   :  { %v660_v24 = vpop.f32.mrf.mxu1 }
  0xb8   :  { %v661_v37 = vadd.f32 %v660_v24, %v631_v23 }
  0xbb   :  { %v689_v30 = vpop.f32.mrf.mxu2 }
  0xbc   :  { %v690_v32 = vadd.f32 %v689_v30, %v661_v37 }
  0xbd   :  { %v634_v52 = vpop.f32.mrf.mxu0 }
  0xbe   :  { %v718_v31 = vpop.f32.mrf.mxu3 }
  0xbf   :  { %v663_v17 = vpop.f32.mrf.mxu1  ;;  %v719_v45 = vadd.f32 %v718_v31, %v690_v32 }
  0xc0   :  { %v664_v4 = vadd.f32 %v663_v17, %v634_v52 }
  0xc4   :  { %v692_v62 = vpop.f32.mrf.mxu2 }
  0xc5   :  { %v637_v13 = vpop.f32.mrf.mxu0  ;;  %v693_v51 = vadd.f32 %v692_v62, %v664_v4 }
  0xc6   :  { %v721_v33 = vpop.f32.mrf.mxu3 }
  0xc7   :  { %v722_v28 = vadd.f32 %v721_v33, %v693_v51 }
  0xc9   :  { %v666_v35 = vpop.f32.mrf.mxu1 }
  0xca   :  { %v667_v58 = vadd.f32 %v666_v35, %v637_v13 }
  0xcc   :  { %v695_v29 = vpop.f32.mrf.mxu2 }
  0xcd   :  { %v696_v0 = vadd.f32 %v695_v29, %v667_v58 }
  0xd1   :  { %v724_v40 = vpop.f32.mrf.mxu3 }
  0xd2   :  { %v725_v9 = vadd.f32 %v724_v40, %v696_v0 }
  0xd3   :  { %v640_v63 = vpop.f32.mrf.mxu0 }
  0xd5   :  { %v669_v53 = vpop.f32.mrf.mxu1 }
  0xd6   :  { %v670_v16 = vadd.f32 %v669_v53, %v640_v63 }
  0xd9   :  { %v698_v18 = vpop.f32.mrf.mxu2 }
  0xda   :  { %v699_v44 = vadd.f32 %v698_v18, %v670_v16 }
  0xdb   :  { %v747_v39 = vpop.f32.mrf.mxu0  ;;  %v727_v43 = vpop.f32.mrf.mxu3 }
  0xdc   :  { %v748_v46 = vadd.f32 %v747_v39, %v719_v45  ;;  %v728_v1 = vadd.f32 %v727_v43, %v699_v44 }
  0xdd   :  { %v776_v61 = vpop.f32.mrf.mxu1 }
  0xde   :  { %v777_v26 = vadd.f32 %v776_v61, %v748_v46 }
  0xe1   :  { %v805_v34 = vpop.f32.mrf.mxu2 }
  0xe2   :  { %v806_v14 = vadd.f32 %v805_v34, %v777_v26 }
  0xe3   :  { %v834_v21 = vpop.f32.mrf.mxu3 }
  0xe4   :  { %v835_v59 = vadd.f32 %v834_v21, %v806_v14 }
  0xe5   :  { %v750_v25 = vpop.f32.mrf.mxu0 }
  0xe6   :  { %v865_v55 = vadd.f32 %v983_v60, %v835_v59  ;;  %v751_v49 = vadd.f32 %v750_v25, %v722_v28 }
  0xe8   :  { %869 = vst [vmem:[#allocation8] sm:$0xff] %v865_v55 }
  0xea   :  { %v779_v22 = vpop.f32.mrf.mxu1 }
  0xeb   :  { %v780_v3 = vadd.f32 %v779_v22, %v751_v49 }
  0xed   :  { %v753_v8 = vpop.f32.mrf.mxu0 }
  0xee   :  { %v754_v41 = vadd.f32 %v753_v8, %v725_v9 }
  0xef   :  { %v808_v12 = vpop.f32.mrf.mxu2 }
  0xf0   :  { %v809_v10 = vadd.f32 %v808_v12, %v780_v3 }
  0xf1   :  { %v837_v42 = vpop.f32.mrf.mxu3 }
  0xf2   :  { %v838_v2 = vadd.f32 %v837_v42, %v809_v10  ;;  %v782_v38 = vpop.f32.mrf.mxu1 }
  0xf3   :  { %v783_v47 = vadd.f32 %v782_v38, %v754_v41 }
  0xf4   :  { %v866_v50 = vadd.f32 %v983_v60, %v838_v2 }
  0xf5   :  { %v756_v6 = vpop.f32.mrf.mxu0 }
  0xf6   :  { %870 = vst [vmem:[#allocation8 + $0x8] sm:$0xff] %v866_v50  ;;  %v757_v7 = vadd.f32 %v756_v6, %v728_v1 }
  0xf7   :  { %v811_v56 = vpop.f32.mrf.mxu2 }
  0xf8   :  { %v812_v15 = vadd.f32 %v811_v56, %v783_v47 }
  0xf9   :  { %v840_v54 = vpop.f32.mrf.mxu3 }
  0xfa   :  { %v841_v36 = vadd.f32 %v840_v54, %v812_v15 }
  0xfc   :  { %v867_v48 = vadd.f32 %v983_v60, %v841_v36 }
  0xfe   :  { %871 = vst [vmem:[#allocation8 + $0x10] sm:$0xff] %v867_v48  ;;  %v785_v19 = vpop.f32.mrf.mxu1 }
  0xff   :  { %v786_v11 = vadd.f32 %v785_v19, %v757_v7 }
 0x100   :  { %v814_v5 = vpop.f32.mrf.mxu2 }
 0x101   :  { %v815_v20 = vadd.f32 %v814_v5, %v786_v11 }
 0x105   :  { %v843_v57 = vpop.f32.mrf.mxu3 }
 0x106   :  { %v844_v27 = vadd.f32 %v843_v57, %v815_v20 }
 0x108   :  { %v868_v23 = vadd.f32 %v983_v60, %v844_v27 }
 0x10a   :  { %872 = vst [vmem:[#allocation8 + $0x18] sm:$0xff] %v868_v23 }
 0x10b   :  { %885 = dma.vmem_to_hbm [thread:$0]  %s878_s15, 512, %s880_s18, [#allocation4], %s1181_s9, %s1181_s9, %s1182_s10  }
 0x10c   :  { %1172 = dma.done.wait [#allocation4], 512  }
 0x10d   :  { %1173 = vsyncadd [#allocation4], 4294966784 }
 0x10e   :  { %1174 = dma.done.wait [#allocation10], 1024  }
 0x10f   :  { %1175 = vsyncadd [#allocation10], 4294966272 }
 0x110   :  { %905 = vsyncpa [#allocation3], 1 }
 0x111   :  { %906 = vsyncpa [#allocation6], 1 }
 0x112   :  { %907 = vsyncpa [#allocation4], 1 }
 0x113   :  { %908 = vsyncpa [#allocation10], 1 }

</bundles_post_ra>
